<compile_context>
chip_gen: v7x
topology: tpu7x:2x2x1
jax: 0.10.0
libtpu: 0.0.40
codegen_flags: <defaults>
</compile_context>

<pallas_src>
import functools

import jax
import jax.numpy as jnp
from jax.experimental import pallas as pl
from jax.experimental.pallas import tpu as pltpu


def _round_up(x: int, m: int) -> int:
    return ((x + m - 1) // m) * m


def _tpu_vmem_budget():
    """(tn_cap, vmem_limit_bytes) per TPU generation.

    v5e/v6e have 128 MiB VMEM -> tile cap 2048, 64 MiB scoped limit.
    v7x has 64 MiB VMEM       -> tile cap 1024, 48 MiB scoped limit.
    Conservative (v7x-safe) defaults if the query is unavailable.
    """
    try:
        vmem_bytes = pltpu.get_tpu_info().vmem_capacity_bytes
    except Exception:  # pragma: no cover - fallback when query unsupported
        vmem_bytes = 64 * 1024 * 1024
    if vmem_bytes >= 96 * 1024 * 1024:
        return 2048, 64 * 1024 * 1024
    return 1024, 48 * 1024 * 1024


def _pick_tn(F: int, cap: int) -> int:
    """Largest multiple-of-128 divisor of F that is <= cap (fallback 128)."""
    best = 128
    t = 128
    top = min(F, cap)
    while t <= top:
        if F % t == 0:
            best = t
        t += 128
    return best


def classifier_head_kernel(x_ref, w1_ref, b1_ref, w2_ref, o_ref, acc_ref,
                           *, tn, n_per_part):
    """Fused tiled pass: out[p] = sum_j tanh(x @ W1[:, tile] + b1[tile]) @ W2[tile, :].

    Grid: (partition p [parallel], tile j within partition [arbitrary]).
    Each partition owns its output block and re-inits the accumulator, so the
    reduction is correct under megacore sharding of the parallel axis.
    """
    p = pl.program_id(0)
    j = pl.program_id(1)

    @pl.when(j == 0)
    def _init():
        acc_ref[...] = jnp.zeros_like(acc_ref)

    # (B_pad, F) bf16 @ (F, tn) bf16 -> f32 on the MXU.
    h = jnp.dot(x_ref[...], w1_ref[...], preferred_element_type=jnp.float32)
    h = jnp.tanh(h + b1_ref[...])                      # f32 bias add + tanh (EUP)

    # Row tile of the VMEM-resident bf16 W2 matching this W1 column tile.
    row_start = pl.multiple_of((p * n_per_part + j) * tn, 128)
    w2_tile = w2_ref[pl.ds(row_start, tn), :]          # (tn, L_pad) bf16
    # (B_pad, tn) bf16 @ (tn, L_pad) bf16 -> f32; accumulate over tiles.
    acc_ref[...] += jnp.dot(h.astype(jnp.bfloat16), w2_tile,
                            preferred_element_type=jnp.float32)

    @pl.when(j == pl.num_programs(1) - 1)
    def _finalize():
        o_ref[...] = acc_ref[...]


def classifier_head(features_pad, w1_tiled, b1_2d, w2_pad):
    """features_pad: (B_pad, F) bf16; w1_tiled: (n_tiles, F, tn) bf16;
    b1_2d: (1, F) f32; w2_pad: (F, L_pad) bf16.
    Returns (num_parts, B_pad, L_pad) f32 partial outputs (no b2)."""
    B_pad, F = features_pad.shape
    n_tiles, F_w1, tn = w1_tiled.shape
    L_pad = w2_pad.shape[1]
    assert F_w1 == F and w2_pad.shape[0] == F
    assert B_pad % 16 == 0 and F % 128 == 0 and tn % 128 == 0 and L_pad % 128 == 0
    assert n_tiles * tn == F

    # Split the reduction into two "parallel" partitions when possible so the
    # two TensorCores on v7x each stream half of W1.  Per-partition output
    # blocks + per-partition accumulator init/finalize keep it correct; on
    # single-TC chips the partitions simply run back to back.
    num_parts = 2 if (n_tiles >= 2 and n_tiles % 2 == 0) else 1
    n_per_part = n_tiles // num_parts

    _, vmem_limit = _tpu_vmem_budget()

    nbytes = lambda a: a.size * a.dtype.itemsize
    cost = pl.CostEstimate(
        flops=2 * B_pad * F * F + 2 * B_pad * F * L_pad,
        transcendentals=B_pad * F,
        bytes_accessed=(nbytes(features_pad) + nbytes(w1_tiled) + nbytes(w2_pad)
                        + nbytes(b1_2d) + num_parts * B_pad * L_pad * 4),
    )

    kernel = functools.partial(classifier_head_kernel, tn=tn, n_per_part=n_per_part)

    return pl.pallas_call(
        kernel,
        out_shape=jax.ShapeDtypeStruct((num_parts, B_pad, L_pad), jnp.float32),
        grid_spec=pltpu.PrefetchScalarGridSpec(
            num_scalar_prefetch=0,
            grid=(num_parts, n_per_part),
            in_specs=[
                # x: small, VMEM-resident across the whole grid.
                pl.BlockSpec((B_pad, F), lambda p, j: (0, 0)),
                # W1: tile-major -> one fully contiguous HBM block per step.
                pl.BlockSpec((pl.Squeezed(), F, tn),
                             lambda p, j: (p * n_per_part + j, 0, 0)),
                # b1: (1, tn) tile matching the W1 column tile.
                pl.BlockSpec((1, tn), lambda p, j: (0, p * n_per_part + j)),
                # W2: bf16, fully VMEM-resident (fetched once).
                pl.BlockSpec((F, L_pad), lambda p, j: (0, 0)),
            ],
            out_specs=pl.BlockSpec((pl.Squeezed(), B_pad, L_pad),
                                   lambda p, j: (p, 0, 0)),
            scratch_shapes=[pltpu.VMEM((B_pad, L_pad), jnp.float32)],
        ),
        compiler_params=pltpu.CompilerParams(
            dimension_semantics=("parallel", "arbitrary"),
            vmem_limit_bytes=vmem_limit,
        ),
        cost_estimate=cost,
    )(features_pad, w1_tiled, b1_2d, w2_pad)


def prepare_classifier_params(w1, b1, w2, b2):
    """One-time parameter prep (hoisted out of the per-forward path):
      * transpose PyTorch (out, in) weights to (in, out),
      * cast W1/W2 to bf16 (precision knob: results deviate slightly from the
        f32 PyTorch module),
      * retile W1 tile-major to (n_tiles, F, tn) for contiguous per-step DMA,
      * zero-pad W2 out to a lane-dense L_pad (multiple of 128)."""
    F = w1.shape[1]
    L = w2.shape[0]
    assert w1.shape == (F, F) and F % 128 == 0
    L_pad = _round_up(L, 128)

    tn_cap, _ = _tpu_vmem_budget()
    tn = _pick_tn(F, tn_cap)
    n_tiles = F // tn

    w1_t = jnp.transpose(w1).astype(jnp.bfloat16)                    # (F, F) in-major
    w1_tiled = w1_t.reshape(F, n_tiles, tn).transpose(1, 0, 2)       # (n_tiles, F, tn)
    b1_2d = b1.reshape(1, F).astype(jnp.float32)                     # (1, F)
    w2_pad = jnp.pad(jnp.transpose(w2), ((0, 0), (0, L_pad - L))
                     ).astype(jnp.bfloat16)                          # (F, L_pad)
    b2_f32 = b2.astype(jnp.float32)                                  # (L,)
    return w1_tiled, b1_2d, w2_pad, b2_f32


def transformer_classifier_stack_forward(hidden_states_last4, w1_tiled, b1_2d,
                                         w2_pad, b2, nb_labels):
    """hidden_states_last4: (4, B, S, H) stacked as [layer -1, -2, -3, -4].

    Mirrors (eval mode, dropout == identity):
        hs_i = hidden_states[-i][:, 0, :]
        features = cat([hs_1, hs_2, hs_3, hs_4], dim=-1)
        out = tanh(features @ W1.T + b1) @ W2.T + b2
    """
    # CLS extraction + concat stays inside the same jit as the pallas_call so
    # XLA fuses it with the padding (no extra HBM round-trip of `features`).
    cls = hidden_states_last4[:, :, 0, :]                     # (4, B, H)
    B = cls.shape[1]
    feats = jnp.transpose(cls, (1, 0, 2)).reshape(B, -1)      # (B, 4H)

    # bf16 packs two rows per sublane -> pad batch to a multiple of 16 so the
    # MXU LHS tile is unmasked.
    B_pad = _round_up(B, 16)
    feats_p = jnp.pad(feats, ((0, B_pad - B), (0, 0))).astype(jnp.bfloat16)

    parts = classifier_head(feats_p, w1_tiled, b1_2d, w2_pad)  # (P, B_pad, L_pad)
    # NOTE: padded rows / padded label columns of `parts` contain
    # tanh(b1)-derived garbage; only the [:B, :nb_labels] slice is meaningful.
    out = jnp.sum(parts, axis=0)[:B, :nb_labels] + b2          # b2 added once, here
    return out


def xavier_uniform(key, shape):
    fan_out, fan_in = shape
    bound = jnp.sqrt(6.0 / (fan_in + fan_out))
    return jax.random.uniform(key, shape, jnp.float32, -bound, bound)


def linear_bias_init(key, fan_in, out_dim):
    bound = 1.0 / jnp.sqrt(fan_in)
    return jax.random.uniform(key, (out_dim,), jnp.float32, -bound, bound)


if __name__ == "__main__":
    # Small, consistent shapes: batch=2, seq=8, hidden_size=32 -> hidden_dim=128
    B, S, H = 2, 8, 32
    HIDDEN_DIM = 4 * H          # 128
    NB_LABELS = 4

    key = jax.random.PRNGKey(0)
    k_hs, k_w1, k_b1, k_w2, k_b2 = jax.random.split(key, 5)

    # Synthetic stand-in for tr_model(...)['hidden_states'][-1..-4], stacked.
    hidden_states_last4 = jax.random.normal(k_hs, (4, B, S, H), jnp.float32)

    # Head parameters (deterministic init matching the module's __init__).
    w1 = xavier_uniform(k_w1, (HIDDEN_DIM, HIDDEN_DIM))      # hl.weight  (out, in)
    b1 = linear_bias_init(k_b1, HIDDEN_DIM, HIDDEN_DIM)      # hl.bias
    w2 = xavier_uniform(k_w2, (NB_LABELS, HIDDEN_DIM))       # last_l.weight
    b2 = linear_bias_init(k_b2, HIDDEN_DIM, NB_LABELS)       # last_l.bias

    # One-time prep (transpose / cast / retile / pad, hoisted out of forward).
    params = prepare_classifier_params(w1, b1, w2, b2)

    fwd = jax.jit(transformer_classifier_stack_forward, static_argnums=(5,))
    out = fwd(hidden_states_last4, *params, NB_LABELS)
    out = jax.block_until_ready(out)
    assert out.shape == (B, NB_LABELS)

    # --- reference checks -------------------------------------------------
    cls = hidden_states_last4[:, :, 0, :]
    feats = jnp.transpose(cls, (1, 0, 2)).reshape(B, -1)

    # (1) Mirrored reference (same bf16 operand streaming as the kernel): tight.
    h_ref = jnp.dot(feats.astype(jnp.bfloat16), w1.T.astype(jnp.bfloat16),
                    preferred_element_type=jnp.float32) + b1
    t_ref = jnp.tanh(h_ref).astype(jnp.bfloat16)
    ref_mirror = jnp.dot(t_ref, w2.T.astype(jnp.bfloat16),
                         preferred_element_type=jnp.float32) + b2
    assert jnp.allclose(out, ref_mirror, atol=5e-3, rtol=5e-3)

    # (2) Full-f32 reference (original module semantics): loose (bf16 operands).
    ref_f32 = jnp.tanh(feats @ w1.T + b1) @ w2.T + b2
    assert jnp.allclose(out, ref_f32, atol=1e-1, rtol=1e-1)

    print("KERNEL_OK")
</pallas_src>

<mosaic_0001>
module attributes {stable_mosaic.version = 11 : i64} {
  func.func @classifier_head_kernel(%arg0: i32, %arg1: i32, %arg2: memref<16x128xbf16, #tpu.memory_space<vmem>>, %arg3: memref<1x128x128xbf16, #tpu.memory_space<vmem>>, %arg4: memref<1x128xf32, #tpu.memory_space<vmem>>, %arg5: memref<128x128xbf16, #tpu.memory_space<vmem>>, %arg6: memref<1x16x128xf32, #tpu.memory_space<vmem>>, %arg7: memref<16x128xf32, #tpu.memory_space<vmem>>) attributes {dimension_semantics = [#tpu.dimension_semantics<parallel>, #tpu.dimension_semantics<arbitrary>], iteration_bounds = array<i64: 1, 1>, scalar_prefetch = 0 : i64, scratch_operands = 1 : i64, tpu.core_type = #tpu.core_type<tc>, window_params = [{pipeline_mode = #tpu.pipeline_mode<synchronous>, transform_indices = @transform_0, window_bounds = array<i64: 16, 128>}, {transform_indices = @transform_1, window_bounds = array<i64: 1, 128, 128>}, {transform_indices = @transform_2, window_bounds = array<i64: 1, 128>}, {pipeline_mode = #tpu.pipeline_mode<synchronous>, transform_indices = @transform_3, window_bounds = array<i64: 128, 128>}, {transform_indices = @transform_4, window_bounds = array<i64: 1, 16, 128>}]} {
    %c0_i32 = arith.constant 0 : i32
    %0 = arith.cmpi eq, %arg1, %c0_i32 : i32
    %1 = arith.extui %0 : i1 to i32
    %c0_i32_0 = arith.constant 0 : i32
    %2 = arith.cmpi ne, %1, %c0_i32_0 : i32
    scf.if %2 {
      %cst_15 = arith.constant 0.000000e+00 : f32
      %25 = vector.broadcast %cst_15 : f32 to vector<16x128xf32>
      %c0_16 = arith.constant 0 : index
      %c0_17 = arith.constant 0 : index
      %26 = vector.load %arg7[%c0_16, %c0_17] : memref<16x128xf32, #tpu.memory_space<vmem>>, vector<16x128xf32>
      tpu.vector_store %arg7[%c0_16, %c0_17], %25 {strides = array<i32>} : memref<16x128xf32, #tpu.memory_space<vmem>>, vector<16x128xf32>,
    } else {
    }
    %c0 = arith.constant 0 : index
    %c0_1 = arith.constant 0 : index
    %3 = vector.load %arg2[%c0, %c0_1] : memref<16x128xbf16, #tpu.memory_space<vmem>>, vector<16x128xbf16>
    %c0_2 = arith.constant 0 : index
    %c0_3 = arith.constant 0 : index
    %c0_4 = arith.constant 0 : index
    %4 = vector.load %arg3[%c0_2, %c0_3, %c0_4] : memref<1x128x128xbf16, #tpu.memory_space<vmem>>, vector<1x128x128xbf16>
    %5 = vector.shape_cast %4 : vector<1x128x128xbf16> to vector<128x128xbf16>
    %cst = arith.constant dense<0.000000e+00> : vector<16x128xf32>
    %6 = tpu.matmul %3, %5, %cst {dimension_numbers = #tpu.dot_dimension_numbers<[1], [0], [0], [1], [0, 0, 1, 1], [], []>} : vector<16x128xbf16>, vector<128x128xbf16>, vector<16x128xf32> -> vector<16x128xf32>
    %c0_5 = arith.constant 0 : index
    %c0_6 = arith.constant 0 : index
    %7 = vector.load %arg4[%c0_5, %c0_6] : memref<1x128xf32, #tpu.memory_space<vmem>>, vector<1x128xf32>
    %8 = vector.broadcast %7 : vector<1x128xf32> to vector<16x128xf32>
    %9 = arith.addf %6, %8 : vector<16x128xf32>
    %10 = math.tanh %9 : vector<16x128xf32>
    %c1_i32 = arith.constant 1 : i32
    %11 = arith.muli %arg0, %c1_i32 : i32
    %12 = arith.addi %11, %arg1 : i32
    %c128_i32 = arith.constant 128 : i32
    %13 = arith.muli %12, %c128_i32 : i32
    %14 = tpu.assume_multiple %13, 128 : i32
    %15 = arith.index_cast %14 : i32 to index
    %c0_7 = arith.constant 0 : index
    %16 = vector.load %arg5[%15, %c0_7] : memref<128x128xbf16, #tpu.memory_space<vmem>>, vector<128x128xbf16>
    %c0_8 = arith.constant 0 : index
    %c0_9 = arith.constant 0 : index
    %17 = vector.load %arg7[%c0_8, %c0_9] : memref<16x128xf32, #tpu.memory_space<vmem>>, vector<16x128xf32>
    %18 = arith.truncf %10 : vector<16x128xf32> to vector<16x128xbf16>
    %cst_10 = arith.constant dense<0.000000e+00> : vector<16x128xf32>
    %19 = tpu.matmul %18, %16, %cst_10 {dimension_numbers = #tpu.dot_dimension_numbers<[1], [0], [0], [1], [0, 0, 1, 1], [], []>} : vector<16x128xbf16>, vector<128x128xbf16>, vector<16x128xf32> -> vector<16x128xf32>
    %20 = arith.addf %17, %19 : vector<16x128xf32>
    %c0_11 = arith.constant 0 : index
    %c0_12 = arith.constant 0 : index
    %21 = vector.load %arg7[%c0_11, %c0_12] : memref<16x128xf32, #tpu.memory_space<vmem>>, vector<16x128xf32>
    tpu.vector_store %arg7[%c0_11, %c0_12], %20 {strides = array<i32>} : memref<16x128xf32, #tpu.memory_space<vmem>>, vector<16x128xf32>,
    %c0_i32_13 = arith.constant 0 : i32
    %22 = arith.cmpi eq, %arg1, %c0_i32_13 : i32
    %23 = arith.extui %22 : i1 to i32
    %c0_i32_14 = arith.constant 0 : i32
    %24 = arith.cmpi ne, %23, %c0_i32_14 : i32
    scf.if %24 {
      %c0_15 = arith.constant 0 : index
      %c0_16 = arith.constant 0 : index
      %25 = vector.load %arg7[%c0_15, %c0_16] : memref<16x128xf32, #tpu.memory_space<vmem>>, vector<16x128xf32>
      %c0_17 = arith.constant 0 : index
      %c0_18 = arith.constant 0 : index
      %c0_19 = arith.constant 0 : index
      %26 = vector.load %arg6[%c0_17, %c0_18, %c0_19] : memref<1x16x128xf32, #tpu.memory_space<vmem>>, vector<1x16x128xf32>
      %27 = vector.shape_cast %26 : vector<1x16x128xf32> to vector<16x128xf32>
      %28 = vector.shape_cast %25 : vector<16x128xf32> to vector<1x16x128xf32>
      tpu.vector_store %arg6[%c0_17, %c0_18, %c0_19], %28 {strides = array<i32>} : memref<1x16x128xf32, #tpu.memory_space<vmem>>, vector<1x16x128xf32>,
    } else {
    }
    return
  }
  func.func @transform_0(%arg0: i32, %arg1: i32) -> (i32, i32) {
    %c0_i32 = arith.constant 0 : i32
    %c0_i32_0 = arith.constant 0 : i32
    %c0_i32_1 = arith.constant 0 : i32
    return %c0_i32, %c0_i32_0 : i32, i32
  }
  func.func @transform_1(%arg0: i32, %arg1: i32) -> (i32, i32, i32) {
    %c1_i32 = arith.constant 1 : i32
    %0 = arith.muli %arg0, %c1_i32 : i32
    %1 = arith.addi %0, %arg1 : i32
    %c0_i32 = arith.constant 0 : i32
    %c0_i32_0 = arith.constant 0 : i32
    %c0_i32_1 = arith.constant 0 : i32
    return %1, %c0_i32, %c0_i32_0 : i32, i32, i32
  }
  func.func @transform_2(%arg0: i32, %arg1: i32) -> (i32, i32) {
    %c1_i32 = arith.constant 1 : i32
    %0 = arith.muli %arg0, %c1_i32 : i32
    %1 = arith.addi %0, %arg1 : i32
    %c0_i32 = arith.constant 0 : i32
    %c0_i32_0 = arith.constant 0 : i32
    return %c0_i32, %1 : i32, i32
  }
  func.func @transform_3(%arg0: i32, %arg1: i32) -> (i32, i32) {
    %c0_i32 = arith.constant 0 : i32
    %c0_i32_0 = arith.constant 0 : i32
    %c0_i32_1 = arith.constant 0 : i32
    return %c0_i32, %c0_i32_0 : i32, i32
  }
  func.func @transform_4(%arg0: i32, %arg1: i32) -> (i32, i32, i32) {
    %c0_i32 = arith.constant 0 : i32
    %c0_i32_0 = arith.constant 0 : i32
    %c0_i32_1 = arith.constant 0 : i32
    return %arg0, %c0_i32, %c0_i32_0 : i32, i32, i32
  }
}

</mosaic_0001>

<bundles_post_ra>
// kernel: transformer_classifier_stack_forward.1
= control target key start
LH: loop header
LB: loop body
LE: loop exit
PB: predicated region body
PF: predicated region fallthrough
CT: control target
= control target key end

     0   :  { %9 = vsyncpa [#allocation4], 0  ;;  %s547_s0 = inlined_call_operand.vmem [shape: bf16[16,128], index: 0, kind: input, shape index: {}]   ;;  %s548_s1 = inlined_call_operand.hbm [shape: bf16[1,128,128], index: 1, kind: input, shape index: {}]   ;;  %s549_s2 = inlined_call_operand.vmem [shape: f32[1,128], index: 2, kind: input, shape index: {}]   ;;  %s550_s3 = inlined_call_operand.hbm [shape: bf16[128,128], index: 3, kind: input, shape index: {}]   ;;  %s551_s4 = inlined_call_operand.vmem [shape: f32[1,16,128], index: 4, kind: output, shape index: {}]  }
   0x1   :  { %10 = vsyncpa [#allocation6], 0  ;;  %s480_s15 = smov [#allocation3]   ;;  %s432_s19 = scalar_lea.hbm %s548_s1, 1024 }
   0x2   :  { %s22_s16 = sshll.u32 %s480_s15, 4  ;;  %p433_p0 = scmp.ne.s32.totalorder %s548_s1, %s432_s19  ;;  %s23_s16 = int_to_ptr.vmem [resolvable:$true] %s22_s16 }
   0x3   :  { %p436_p1 = scmp.lt.u32.totalorder %s432_s19, %s548_s1 }
   0x5   :  { %p438_p2 = pnand %p436_p1, %p433_p0 }
   0x7   :  { %441 = shalt.err (!%p438_p2)
}
   0x8   :  { %s442_s24 = scalar_lea.vmem %s23_s16, 1024  ;;  %p447_p4 = scmp.lt.s32.totalorder %s23_s16, %s23_s16 }
   0x9   :  { %p443_p3 = scmp.ne.s32.totalorder %s23_s16, %s442_s24  ;;  %p448_p5 = scmp.lt.s32.totalorder %s442_s24, %s442_s24 }
   0xb   :  { %p449_p6 = por %p448_p5, %p447_p4 }
   0xd   :  { %p450_p7 = pnand %p449_p6, %p443_p3 }
   0xf   :  { %453 = shalt.err (!%p450_p7)
}
  0x10   :  { %s481_s25 = smov 64   ;;  %s482_s26 = smov 4  }
  0x11   :  { %28 = dma.hbm_to_vmem [thread:$0]  %s548_s1, 1024, %s23_s16, [#allocation4], %s481_s25, %s481_s25, %s482_s26  }
  0x12   :  { %s483_s29 = smov [#allocation5]   ;;  %s454_s7 = scalar_lea.hbm %s550_s3, 1024 }
  0x13   :  { %s41_s30 = sshll.u32 %s483_s29, 4  ;;  %p455_p8 = scmp.ne.s32.totalorder %s550_s3, %s454_s7  ;;  %s42_s30 = int_to_ptr.vmem [resolvable:$true] %s41_s30 }
  0x14   :  { %p458_p9 = scmp.lt.u32.totalorder %s454_s7, %s550_s3 }
  0x16   :  { %p460_p10 = pnand %p458_p9, %p455_p8 }
  0x18   :  { %463 = shalt.err (!%p460_p10)
}
  0x19   :  { %s464_s12 = scalar_lea.vmem %s42_s30, 1024  ;;  %p469_p12 = scmp.lt.s32.totalorder %s42_s30, %s42_s30 }
  0x1a   :  { %p465_p11 = scmp.ne.s32.totalorder %s42_s30, %s464_s12  ;;  %p470_p13 = scmp.lt.s32.totalorder %s464_s12, %s464_s12 }
  0x1c   :  { %p471_p0 = por %p470_p13, %p469_p12 }
  0x1e   :  { %p472_p1 = pnand %p471_p0, %p465_p11 }
  0x20   :  { %475 = shalt.err (!%p472_p1)
}
  0x21   :  { %47 = dma.hbm_to_vmem [thread:$0]  %s550_s3, 1024, %s42_s30, [#allocation6], %s481_s25, %s481_s25, %s482_s26  }
  0x22   :  { %476 = dma.done.wait [#allocation4], 1024  }
  0x23   :  { %477 = vsyncadd [#allocation4], 4294966272 }
  0x24   :  { %478 = dma.done.wait [#allocation6], 1024  }
  0x25   :  { %479 = vsyncadd [#allocation6], 4294966272  ;;  %v484_v0 = vmov 0.0   ;;  %vm485_vm0 = vmmov 0   ;;  %v411_v1 = vld [vmem:[#allocation3] sm:$0xff]   ;;  %v412_v2 = vld [vmem:[#allocation3 + $0x8] sm:$0xff]  }
  0x26   :  { %365 = vmatprep.subr.bf16.mxu0 %v484_v0  ;;  %381 = vmatprep.mubr.msk.bf16.mxu0 %vm485_vm0, %v484_v0  ;;  %v413_v3 = vld [vmem:[#allocation3 + $0x10] sm:$0xff]   ;;  %v420_v4 = vld [vmem:[#allocation5] sm:$0xff]   ;;  %v414_v5 = vld [vmem:[#allocation3 + $0x18] sm:$0xff]  }
  0x27   :  { %385 = vmatprep.subr.bf16.mxu1 %v484_v0  ;;  %401 = vmatprep.mubr.msk.bf16.mxu1 %vm485_vm0, %v484_v0  ;;  %v421_v6 = vld [vmem:[#allocation5 + $0x8] sm:$0xff]   ;;  %v415_v7 = vld [vmem:[#allocation3 + $0x20] sm:$0xff]   ;;  %v422_v8 = vld [vmem:[#allocation5 + $0x10] sm:$0xff]  }
  0x28   :  { %366 = vmatpush3.bf16.msra.mxu0 %v411_v1  ;;  %386 = vmatpush3.bf16.msra.mxu1 %v420_v4  ;;  %v416_v9 = vld [vmem:[#allocation3 + $0x28] sm:$0xff]   ;;  %v423_v10 = vld [vmem:[#allocation5 + $0x18] sm:$0xff]   ;;  %v417_v11 = vld [vmem:[#allocation3 + $0x30] sm:$0xff]  }
  0x29   :  { %367 = vmatprep.subr.bf16.mxu0 %v484_v0  ;;  %387 = vmatprep.subr.bf16.mxu1 %v484_v0  ;;  %v418_v12 = vld [vmem:[#allocation3 + $0x38] sm:$0xff]   ;;  %v419_v13 = vld [vmem:[%s547_s0] sm:$0xff]   ;;  %v425_v15 = vld [vmem:[#allocation5 + $0x28] sm:$0xff]  }
  0x2a   :  { %v424_v14 = vld [vmem:[#allocation5 + $0x20] sm:$0xff]   ;;  %v426_v16 = vld [vmem:[#allocation5 + $0x30] sm:$0xff]   ;;  %v427_v17 = vld [vmem:[#allocation5 + $0x38] sm:$0xff]  }
  0x2b   :  { %v329_v18 = vld [vmem:[%s549_s2] ss:$0 sm:$0xff] }
  0x2c   :  { %368 = vmatpush3.bf16.msra.mxu0 %v412_v2  ;;  %388 = vmatpush3.bf16.msra.mxu1 %v421_v6 }
  0x2d   :  { %369 = vmatprep.subr.bf16.mxu0 %v484_v0  ;;  %389 = vmatprep.subr.bf16.mxu1 %v484_v0 }
  0x30   :  { %370 = vmatpush3.bf16.msra.mxu0 %v413_v3  ;;  %390 = vmatpush3.bf16.msra.mxu1 %v422_v8 }
  0x31   :  { %371 = vmatprep.subr.bf16.mxu0 %v484_v0  ;;  %391 = vmatprep.subr.bf16.mxu1 %v484_v0 }
  0x34   :  { %372 = vmatpush3.bf16.msra.mxu0 %v414_v5  ;;  %392 = vmatpush3.bf16.msra.mxu1 %v423_v10 }
  0x35   :  { %373 = vmatprep.subr.bf16.mxu0 %v484_v0  ;;  %393 = vmatprep.subr.bf16.mxu1 %v484_v0 }
  0x38   :  { %374 = vmatpush3.bf16.msra.mxu0 %v415_v7  ;;  %394 = vmatpush3.bf16.msra.mxu1 %v424_v14 }
  0x39   :  { %375 = vmatprep.subr.bf16.mxu0 %v484_v0  ;;  %395 = vmatprep.subr.bf16.mxu1 %v484_v0 }
  0x3c   :  { %376 = vmatpush3.bf16.msra.mxu0 %v416_v9  ;;  %396 = vmatpush3.bf16.msra.mxu1 %v425_v15 }
  0x3d   :  { %377 = vmatprep.subr.bf16.mxu0 %v484_v0  ;;  %397 = vmatprep.subr.bf16.mxu1 %v484_v0 }
  0x40   :  { %378 = vmatpush3.bf16.msra.mxu0 %v417_v11  ;;  %398 = vmatpush3.bf16.msra.mxu1 %v426_v16 }
  0x41   :  { %379 = vmatprep.subr.bf16.mxu0 %v484_v0  ;;  %399 = vmatprep.subr.bf16.mxu1 %v484_v0 }
  0x44   :  { %380 = vmatpush3.bf16.msra.mxu0 %v418_v12  ;;  %400 = vmatpush3.bf16.msra.mxu1 %v427_v17 }
  0x47   :  { %382 = vmatmul.mubr.bf16.vlgmr.msra.gmra.mrb[0].mxu0 %v419_v13 }
 0x11a   :  { %v184_v19 = vpop.f32.mrb[0].mxu0 }
 0x11b   :  { %v185_v20 = vadd.f32 %v329_v18, %v184_v19  ;;  %v383_v21 = vpop.f32.mrb[1].mxu0 }
 0x11c   :  { %v187_v22 = vpop.f32.mrb[2].mxu0 }
 0x11d   :  { %v188_v23 = vadd.f32 %v329_v18, %v187_v22  ;;  %v384_v24 = vpop.f32.mrb[3].mxu0  ;;  %428 = vtanh.f32 %v185_v20 }
 0x11f   :  { %430 = vtanh.f32 %v188_v23 }
 0x127   :  { %v429_v25 = vpop.eup %428 }
 0x129   :  { %v431_v26 = vpop.eup %430 }
 0x12a   :  { %v217_v27 = vpack.c.bf16 %v431_v26, %v429_v25 }
 0x12c   :  { %402 = vmatmul.mubr.bf16.vlgmr.msra.gmra.mrb[0].mxu1 %v217_v27 }
 0x1ff   :  { %v300_v28 = vpop.f32.mrb[0].mxu1 }
 0x200   :  { %316 = vst [vmem:[%s551_s4] sm:$0xff] %v300_v28  ;;  %v403_v29 = vpop.f32.mrb[1].mxu1 }
 0x201   :  { %v303_v30 = vpop.f32.mrb[2].mxu1 }
 0x202   :  { %317 = vst [vmem:[%s551_s4 + $0x8] sm:$0xff] %v303_v30  ;;  %v404_v31 = vpop.f32.mrb[3].mxu1 }
 0x203   :  { %322 = vsyncpa [#allocation4], 1 }
 0x204   :  { %323 = vsyncpa [#allocation6], 1 }

</bundles_post_ra>
